<compile_context>
chip_gen: v7x
topology: tpu7x:2x2x1
jax: 0.10.0
libtpu: 0.0.40
codegen_flags: <defaults>
</compile_context>

<pallas_src>
import jax
import jax.numpy as jnp
from jax.experimental import pallas as pl
from jax.experimental.pallas import tpu as pltpu


def _pick_hw_tile(HW, C):
    # Keep the pass-2 working set (2 input + 2 output double-buffered f32
    # blocks of (C, T)) around <= 8 MiB so the default scoped-VMEM limit is
    # comfortable on v5e/v6e/v7x, while keeping >= 512 lanes per grid step.
    budget_elems = (8 * 1024 * 1024) // 16          # C * T element budget
    t = (budget_elems // max(C, 1)) // 512 * 512
    t = max(512, min(t, 4096))
    if HW <= t:
        return HW                                   # single full-width tile (legal: == full dim)
    return t                                        # multiple of 512 (legal: % 128 == 0)


def _make_pool_mlp_kernel(HW, T, C):
    needs_mask = (HW % T) != 0                      # only possible when HW is tiled
    chunk = 512 if (T % 512 == 0) else T
    nchunks = T // chunk

    def kernel(x_ref, w1_ref, w2_ref, att_ref, sum_acc, max_acc):
        t = pl.program_id(1)

        @pl.when(t == 0)
        def _init():
            sum_acc[...] = jnp.zeros_like(sum_acc)
            max_acc[...] = jnp.full_like(max_acc, -jnp.inf)

        def chunk_body(c, carry):
            s, m = carry
            start = pl.multiple_of(c * chunk, chunk)
            xc = x_ref[0, :, pl.ds(start, chunk)].astype(jnp.float32)     # (C, chunk)
            if needs_mask:
                gidx = (t * T + c * chunk
                        + jax.lax.broadcasted_iota(jnp.int32, (C, chunk), 1))
                valid = gidx < HW
                s = s + jnp.sum(jnp.where(valid, xc, 0.0), axis=1, keepdims=True)
                m = jnp.maximum(
                    m, jnp.max(jnp.where(valid, xc, -jnp.inf), axis=1, keepdims=True))
            else:
                s = s + jnp.sum(xc, axis=1, keepdims=True)
                m = jnp.maximum(m, jnp.max(xc, axis=1, keepdims=True))
            return s, m

        init = (jnp.zeros((C, 1), jnp.float32),
                jnp.full((C, 1), -jnp.inf, jnp.float32))
        s, m = jax.lax.fori_loop(0, nchunks, chunk_body, init,
                                 unroll=(nchunks <= 8))
        sum_acc[...] = sum_acc[...] + s
        max_acc[...] = jnp.maximum(max_acc[...], m)

        @pl.when(t == pl.num_programs(1) - 1)
        def _finalize():
            avg = sum_acc[...] * (1.0 / HW)                               # (C, 1)
            p = jnp.concatenate([avg, max_acc[...]], axis=1)              # (C, 2) = [avg | max]
            w1 = w1_ref[...].astype(jnp.float32)                          # (Cr, C)
            w2 = w2_ref[...].astype(jnp.float32)                          # (C, Cr)
            h = jnp.maximum(
                jnp.dot(w1, p, preferred_element_type=jnp.float32), 0.0)  # (Cr, 2)
            y = jnp.dot(w2, h, preferred_element_type=jnp.float32)        # (C, 2)
            att = jax.nn.sigmoid(jnp.sum(y, axis=1, keepdims=True))       # (C, 1)
            att_ref[0] = att.astype(att_ref.dtype)

    return kernel


def _scale_kernel(x_ref, att_ref, o_ref):
    x = x_ref[0]                                    # (C, T), input dtype (no f32 blow-up)
    w = att_ref[0].astype(x.dtype)                  # (C, 1) broadcast over lanes
    o_ref[0] = (x * w).astype(o_ref.dtype)


def channel_attention(x, w1, w2, batch_first=True):
    """x: (B, C, H, W); w1: (C//r, C); w2: (C, C//r). Returns same layout as input."""
    if not batch_first:
        x = jnp.transpose(x, (1, 0, 2, 3))

    B, C, H, W = x.shape
    Cr = w1.shape[0]
    HW = H * W

    # Free view: NCHW row-major -> (B, C, HW). No transposes anywhere.
    x_flat = x.reshape(B, C, HW)

    T = _pick_hw_tile(HW, C)
    nT = pl.cdiv(HW, T)

    # Pass 1: per-channel avg/max pooling + shared MLP + sigmoid -> (B, C, 1) weights.
    att = pl.pallas_call(
        _make_pool_mlp_kernel(HW, T, C),
        out_shape=jax.ShapeDtypeStruct((B, C, 1), jnp.float32),
        grid=(B, nT),
        in_specs=[
            pl.BlockSpec((1, C, T), lambda b, t: (b, 0, t)),
            pl.BlockSpec((Cr, C), lambda b, t: (0, 0)),
            pl.BlockSpec((C, Cr), lambda b, t: (0, 0)),
        ],
        out_specs=pl.BlockSpec((1, C, 1), lambda b, t: (b, 0, 0)),
        scratch_shapes=[pltpu.VMEM((C, 1), jnp.float32),
                        pltpu.VMEM((C, 1), jnp.float32)],
        compiler_params=pltpu.CompilerParams(
            dimension_semantics=("parallel", "arbitrary")),
    )(x_flat, w1, w2)

    # Pass 2: lane-dense broadcast scale, fully parallel over (B, HW tiles).
    out_flat = pl.pallas_call(
        _scale_kernel,
        out_shape=jax.ShapeDtypeStruct((B, C, HW), x.dtype),
        grid=(B, nT),
        in_specs=[
            pl.BlockSpec((1, C, T), lambda b, t: (b, 0, t)),
            pl.BlockSpec((1, C, 1), lambda b, t: (b, 0, 0)),
        ],
        out_specs=pl.BlockSpec((1, C, T), lambda b, t: (b, 0, t)),
        compiler_params=pltpu.CompilerParams(
            dimension_semantics=("parallel", "parallel")),
    )(x_flat, att)

    out = out_flat.reshape(B, C, H, W)
    if not batch_first:
        out = jnp.transpose(out, (1, 0, 2, 3))
    return out


def channel_attention_ref(x, w1, w2):
    """Pure-JAX reference mirroring the PyTorch forward (batch_first=True)."""
    avg = jnp.mean(x, axis=(2, 3))                  # (B, C)
    mx = jnp.max(x, axis=(2, 3))                    # (B, C)

    def mlp(p):
        return jnp.maximum(p @ w1.T, 0.0) @ w2.T

    w = jax.nn.sigmoid(mlp(avg) + mlp(mx))          # (B, C)
    return x * w[:, :, None, None]


if __name__ == "__main__":
    # Small shapes consistent with the module: (batch, channel, h, w)
    B, C, H, W = 2, 8, 16, 16
    reduction = 4
    Cr = C // reduction

    key = jax.random.PRNGKey(0)
    kx, k1, k2 = jax.random.split(key, 3)
    x = jax.random.normal(kx, (B, C, H, W), dtype=jnp.float32)
    # Conv2d(C, C//r, 1, bias=False).weight -> (C//r, C)
    w1 = jax.random.normal(k1, (Cr, C), dtype=jnp.float32) * 0.1
    # Conv2d(C//r, C, 1, bias=False).weight -> (C, C//r)
    w2 = jax.random.normal(k2, (C, Cr), dtype=jnp.float32) * 0.1

    out = channel_attention(x, w1, w2, batch_first=True)
    out = jax.block_until_ready(out)

    ref = channel_attention_ref(x, w1, w2)
    assert out.shape == (B, C, H, W)
    assert jnp.allclose(out, ref, atol=1e-5, rtol=1e-5), "mismatch vs reference"

    print("KERNEL_OK")
</pallas_src>

<mosaic_0001>
module attributes {stable_mosaic.version = 11 : i64} {
  func.func @kernel(%arg0: i32, %arg1: i32, %arg2: memref<1x8x256xf32, #tpu.memory_space<vmem>>, %arg3: memref<2x8xf32, #tpu.memory_space<vmem>>, %arg4: memref<8x2xf32, #tpu.memory_space<vmem>>, %arg5: memref<1x8x1xf32, #tpu.memory_space<vmem>>, %arg6: memref<8x1xf32, #tpu.memory_space<vmem>>, %arg7: memref<8x1xf32, #tpu.memory_space<vmem>>) attributes {dimension_semantics = [#tpu.dimension_semantics<parallel>, #tpu.dimension_semantics<arbitrary>], iteration_bounds = array<i64: 2, 1>, scalar_prefetch = 0 : i64, scratch_operands = 2 : i64, tpu.core_type = #tpu.core_type<tc>, window_params = [{transform_indices = @transform_0, window_bounds = array<i64: 1, 8, 256>}, {pipeline_mode = #tpu.pipeline_mode<synchronous>, transform_indices = @transform_1, window_bounds = array<i64: 2, 8>}, {pipeline_mode = #tpu.pipeline_mode<synchronous>, transform_indices = @transform_2, window_bounds = array<i64: 8, 2>}, {transform_indices = @transform_3, window_bounds = array<i64: 1, 8, 1>}]} {
    %c0_i32 = arith.constant 0 : i32
    %0 = arith.cmpi eq, %arg1, %c0_i32 : i32
    %1 = arith.extui %0 : i1 to i32
    %c0_i32_0 = arith.constant 0 : i32
    %2 = arith.cmpi ne, %1, %c0_i32_0 : i32
    scf.if %2 {
      %cst_16 = arith.constant 0.000000e+00 : f32
      %25 = vector.broadcast %cst_16 : f32 to vector<8x1xf32>
      %c0_17 = arith.constant 0 : index
      %c0_18 = arith.constant 0 : index
      %26 = vector.load %arg6[%c0_17, %c0_18] : memref<8x1xf32, #tpu.memory_space<vmem>>, vector<8x1xf32>
      tpu.vector_store %arg6[%c0_17, %c0_18], %25 {strides = array<i32>} : memref<8x1xf32, #tpu.memory_space<vmem>>, vector<8x1xf32>,
      %cst_19 = arith.constant 0xFF800000 : f32
      %27 = vector.broadcast %cst_19 : f32 to vector<8x1xf32>
      %c0_20 = arith.constant 0 : index
      %c0_21 = arith.constant 0 : index
      %28 = vector.load %arg7[%c0_20, %c0_21] : memref<8x1xf32, #tpu.memory_space<vmem>>, vector<8x1xf32>
      tpu.vector_store %arg7[%c0_20, %c0_21], %27 {strides = array<i32>} : memref<8x1xf32, #tpu.memory_space<vmem>>, vector<8x1xf32>,
    } else {
    }
    %cst = arith.constant 0.000000e+00 : f32
    %3 = vector.broadcast %cst : f32 to vector<8x1xf32>
    %cst_1 = arith.constant 0xFF800000 : f32
    %4 = vector.broadcast %cst_1 : f32 to vector<8x1xf32>
    %c0_i32_2 = arith.constant 0 : i32
    %c256_i32 = arith.constant 256 : i32
    %5 = arith.muli %c0_i32_2, %c256_i32 : i32
    %6 = tpu.assume_multiple %5, 256 : i32
    %c0 = arith.constant 0 : index
    %c0_3 = arith.constant 0 : index
    %7 = arith.index_cast %6 : i32 to index
    %8 = vector.load %arg2[%c0, %c0_3, %7] : memref<1x8x256xf32, #tpu.memory_space<vmem>>, vector<1x8x256xf32>
    %9 = vector.shape_cast %8 : vector<1x8x256xf32> to vector<8x256xf32>
    %cst_4 = arith.constant dense<0.000000e+00> : vector<8xf32>
    %10 = vector.multi_reduction <add>, %9, %cst_4 [1] : vector<8x256xf32> to vector<8xf32>
    %11 = vector.shape_cast %10 : vector<8xf32> to vector<8x1xf32>
    %12 = arith.addf %3, %11 : vector<8x1xf32>
    %cst_5 = arith.constant dense<0xFF800000> : vector<8xf32>
    %13 = vector.multi_reduction <maximumf>, %9, %cst_5 [1] : vector<8x256xf32> to vector<8xf32>
    %14 = vector.shape_cast %13 : vector<8xf32> to vector<8x1xf32>
    %15 = arith.maximumf %4, %14 : vector<8x1xf32>
    %c1_i32 = arith.constant 1 : i32
    %c0_6 = arith.constant 0 : index
    %c0_7 = arith.constant 0 : index
    %16 = vector.load %arg6[%c0_6, %c0_7] : memref<8x1xf32, #tpu.memory_space<vmem>>, vector<8x1xf32>
    %17 = arith.addf %16, %12 : vector<8x1xf32>
    %c0_8 = arith.constant 0 : index
    %c0_9 = arith.constant 0 : index
    %18 = vector.load %arg6[%c0_8, %c0_9] : memref<8x1xf32, #tpu.memory_space<vmem>>, vector<8x1xf32>
    tpu.vector_store %arg6[%c0_8, %c0_9], %17 {strides = array<i32>} : memref<8x1xf32, #tpu.memory_space<vmem>>, vector<8x1xf32>,
    %c0_10 = arith.constant 0 : index
    %c0_11 = arith.constant 0 : index
    %19 = vector.load %arg7[%c0_10, %c0_11] : memref<8x1xf32, #tpu.memory_space<vmem>>, vector<8x1xf32>
    %20 = arith.maximumf %19, %15 : vector<8x1xf32>
    %c0_12 = arith.constant 0 : index
    %c0_13 = arith.constant 0 : index
    %21 = vector.load %arg7[%c0_12, %c0_13] : memref<8x1xf32, #tpu.memory_space<vmem>>, vector<8x1xf32>
    tpu.vector_store %arg7[%c0_12, %c0_13], %20 {strides = array<i32>} : memref<8x1xf32, #tpu.memory_space<vmem>>, vector<8x1xf32>,
    %c0_i32_14 = arith.constant 0 : i32
    %22 = arith.cmpi eq, %arg1, %c0_i32_14 : i32
    %23 = arith.extui %22 : i1 to i32
    %c0_i32_15 = arith.constant 0 : i32
    %24 = arith.cmpi ne, %23, %c0_i32_15 : i32
    scf.if %24 {
      %c0_16 = arith.constant 0 : index
      %c0_17 = arith.constant 0 : index
      %25 = vector.load %arg6[%c0_16, %c0_17] : memref<8x1xf32, #tpu.memory_space<vmem>>, vector<8x1xf32>
      %cst_18 = arith.constant 3.906250e-03 : f32
      %26 = vector.broadcast %cst_18 : f32 to vector<8x1xf32>
      %27 = arith.mulf %25, %26 : vector<8x1xf32>
      %c0_19 = arith.constant 0 : index
      %c0_20 = arith.constant 0 : index
      %28 = vector.load %arg7[%c0_19, %c0_20] : memref<8x1xf32, #tpu.memory_space<vmem>>, vector<8x1xf32>
      %29 = tpu.concatenate %27, %28 in 1 : vector<8x1xf32>, vector<8x1xf32> -> vector<8x2xf32>
      %c0_21 = arith.constant 0 : index
      %c0_22 = arith.constant 0 : index
      %30 = vector.load %arg3[%c0_21, %c0_22] : memref<2x8xf32, #tpu.memory_space<vmem>>, vector<2x8xf32>
      %c0_23 = arith.constant 0 : index
      %c0_24 = arith.constant 0 : index
      %31 = vector.load %arg4[%c0_23, %c0_24] : memref<8x2xf32, #tpu.memory_space<vmem>>, vector<8x2xf32>
      %cst_25 = arith.constant dense<0.000000e+00> : vector<2x2xf32>
      %32 = tpu.matmul %30, %29, %cst_25 {dimension_numbers = #tpu.dot_dimension_numbers<[1], [0], [0], [1], [0, 0, 1, 1], [], []>} : vector<2x8xf32>, vector<8x2xf32>, vector<2x2xf32> -> vector<2x2xf32>
      %cst_26 = arith.constant 0.000000e+00 : f32
      %33 = vector.broadcast %cst_26 : f32 to vector<2x2xf32>
      %34 = arith.maximumf %32, %33 : vector<2x2xf32>
      %cst_27 = arith.constant dense<0.000000e+00> : vector<8x2xf32>
      %35 = tpu.matmul %31, %34, %cst_27 {dimension_numbers = #tpu.dot_dimension_numbers<[1], [0], [0], [1], [0, 0, 1, 1], [], []>} : vector<8x2xf32>, vector<2x2xf32>, vector<8x2xf32> -> vector<8x2xf32>
      %cst_28 = arith.constant dense<0.000000e+00> : vector<8xf32>
      %36 = vector.multi_reduction <add>, %35, %cst_28 [1] : vector<8x2xf32> to vector<8xf32>
      %37 = vector.shape_cast %36 : vector<8xf32> to vector<8x1xf32>
      %38 = arith.negf %37 : vector<8x1xf32>
      %39 = math.exp %38 : vector<8x1xf32>
      %cst_29 = arith.constant 1.000000e+00 : f32
      %40 = vector.broadcast %cst_29 : f32 to vector<8x1xf32>
      %41 = arith.addf %40, %39 : vector<8x1xf32>
      %42 = arith.divf %40, %41 : vector<8x1xf32>
      %c0_30 = arith.constant 0 : index
      %c0_31 = arith.constant 0 : index
      %c0_32 = arith.constant 0 : index
      %43 = vector.load %arg5[%c0_30, %c0_31, %c0_32] : memref<1x8x1xf32, #tpu.memory_space<vmem>>, vector<1x8x1xf32>
      %44 = vector.shape_cast %43 : vector<1x8x1xf32> to vector<8x1xf32>
      %45 = vector.shape_cast %42 : vector<8x1xf32> to vector<1x8x1xf32>
      tpu.vector_store %arg5[%c0_30, %c0_31, %c0_32], %45 {strides = array<i32>} : memref<1x8x1xf32, #tpu.memory_space<vmem>>, vector<1x8x1xf32>,
    } else {
    }
    return
  }
  func.func @transform_0(%arg0: i32, %arg1: i32) -> (i32, i32, i32) {
    %c0_i32 = arith.constant 0 : i32
    %c0_i32_0 = arith.constant 0 : i32
    return %arg0, %c0_i32, %arg1 : i32, i32, i32
  }
  func.func @transform_1(%arg0: i32, %arg1: i32) -> (i32, i32) {
    %c0_i32 = arith.constant 0 : i32
    %c0_i32_0 = arith.constant 0 : i32
    %c0_i32_1 = arith.constant 0 : i32
    return %c0_i32, %c0_i32_0 : i32, i32
  }
  func.func @transform_2(%arg0: i32, %arg1: i32) -> (i32, i32) {
    %c0_i32 = arith.constant 0 : i32
    %c0_i32_0 = arith.constant 0 : i32
    %c0_i32_1 = arith.constant 0 : i32
    return %c0_i32, %c0_i32_0 : i32, i32
  }
  func.func @transform_3(%arg0: i32, %arg1: i32) -> (i32, i32, i32) {
    %c0_i32 = arith.constant 0 : i32
    %c0_i32_0 = arith.constant 0 : i32
    %c0_i32_1 = arith.constant 0 : i32
    return %arg0, %c0_i32, %c0_i32_0 : i32, i32, i32
  }
}

</mosaic_0001>

<bundles_post_ra>
// kernel: tpu_custom_call.1
= control target key start
LH: loop header
LB: loop body
LE: loop exit
PB: predicated region body
PF: predicated region fallthrough
CT: control target
= control target key end

     0   :  { %8 = vsyncpa [#allocation5], 0  ;;  %s817_s0 = inlined_call_operand.hbm [shape: f32[2,8,256], index: 0, kind: input, shape index: {}]   ;;  %s818_s1 = inlined_call_operand.vmem [shape: f32[2,8], index: 1, kind: input, shape index: {}]   ;;  %s819_s2 = inlined_call_operand.vmem [shape: f32[8,2], index: 2, kind: input, shape index: {}]   ;;  %s820_s3 = inlined_call_operand.vmem [shape: f32[2,8,1], index: 3, kind: output, shape index: {}]  }
   0x1   :  { %10 = vsyncpa [#allocation5 + $0x1], 0  ;;  %s680_s12 = smov 0   ;;  %s682_s13 = smov 0  }
   0x2   :  { %s684_s14 = smov 0   ;;  %s686_s15 = smov 0  }
   0x3   :  { %s688_s16 = smov 0   ;;  %s690_s17 = smov 0  }
   0x4 LB: > { %s479_s18 = sadd.s32 4294967295, %s653_s17   ;;  %s28_s19 = sadd.s32 1, %s649_s16  ;;  %s653_s17 = sphi %s690_s17, %s16_s17   ;;  %s649_s16 = sphi %s688_s16, %s830_s16   ;;  %s645_s15 = sphi %s686_s15, %s829_s15   ;;  %s641_s14 = sphi %s684_s14, %s828_s14   ;;  %s637_s13 = sphi %s682_s13, %s827_s13   ;;  %s633_s12 = sphi %s680_s12, %s826_s12  }
   0x5   : > { %p30_p0 = scmp.ge.s32.totalorder %s28_s19, 2  ;;  %s37_s20 = sadd.s32 1, %s641_s14 }
   0x6   : > { %p44_p1 = scmp.ne.s32.totalorder %s641_s14, %s637_s13  ;;  %p45_p2 = scmp.eq.s32.totalorder %s653_s17, 0 }
   0x7   : > { %s832_s19 = smov (%p30_p0, %s28_s19), 0  ;;  %p50_p4 = scmp.ne.s32.totalorder %s637_s13, %s633_s12 }
   0x8   : > { %p716_p3 = por %p45_p2, %p44_p1  ;;  %s32_s22 = ssub.s32 %s649_s16, %s832_s19 }
   0x9   : > { %p51_p5 = scmp.eq.s32.totalorder %s479_s18, 0  ;;  %p35_p6 = scmp.eq.s32.totalorder %s32_s22, 0 }
   0xa   : > { %p516_p8 = scmp.lt.s32.totalorder %s653_s17, 2  ;;  %s148_s25 = sand.u32 1, %s641_s14  }
   0xb   : > { %p723_p7 = por %p51_p5, %p50_p4  ;;  %s495_s26 = sshll.u32 %s649_s16, 8 }
   0xc   : > { %s729_s24 = scalar_select %p35_p6, %s641_s14, %s37_s20  }
   0xd   : > { %s483_s27 = sshll.u32 %s148_s25, 4  ;;  %s736_s30 = scalar_lea.hbm %s817_s0, %s495_s26 }
   0xe   : > { %s152_s4 = scalar_lea.vmem [#allocation4], %s483_s27  ;;  %p740_p9 = pnand %p516_p8, %p716_p3 }
   0xf   : > { %s162_s5 = sshll.u32 %s152_s4, 4  ;;  %s149_s7 = scalar_lea.sflag [#allocation5], %s148_s25  ;;  %s744_s5 = int_to_ptr.vmem [resolvable:$true] %s162_s5 }
  0x10   : > { %s573_s8 = scalar_lea.hbm %s736_s30, 256  ;;  %p575_p13 = pneg %p740_p9 }
  0x11   : > { %p574_p12 = scmp.ne.s32.totalorder %s736_s30, %s573_s8  ;;  %s578_s11 = scalar_lea.hbm %s817_s0, 512 }
  0x12   : > { %p579_p2 = scmp.lt.u32.totalorder %s736_s30, %s817_s0  ;;  %p580_p3 = scmp.lt.u32.totalorder %s578_s11, %s573_s8 }
  0x13   : > { %p576_p0 = pnand %p575_p13, %p574_p12  ;;  %p582_p5 = scmp.lt.u32.totalorder %s573_s8, %s736_s30 }
  0x14   : > { %p581_p4 = por %p580_p3, %p579_p2 }
  0x15   : > { %p577_p1 = pneg %p576_p0 }
  0x16   : > { %p583_p6 = por %p582_p5, %p581_p4 }
  0x18   : > { %p584_p8 = pnand %p583_p6, %p577_p1 }
  0x1a   : > { %587 = shalt.err (!%p584_p8)
}
  0x1b   : > { %s588_s20 = scalar_lea.vmem %s744_s5, 256  ;;  %s655_s21 = smov [#allocation4]  }
  0x1c   : > { %p589_p12 = scmp.ne.s32.totalorder %s744_s5, %s588_s20  ;;  %s593_s22 = sshll.u32 %s655_s21, 4  ;;  %s594_s22 = int_to_ptr.vmem [resolvable:$false] %s593_s22 }
  0x1d   : > { %s595_s25 = scalar_lea.vmem %s594_s22, 512  ;;  %p596_p11 = scmp.lt.s32.totalorder %s744_s5, %s594_s22 }
  0x1e   : > { %p591_p0 = pnand %p589_p12, %p575_p13  ;;  %p597_p2 = scmp.lt.s32.totalorder %s595_s25, %s588_s20 }
  0x20   : > { %p592_p10 = pneg %p591_p0  ;;  %p598_p3 = por %p597_p2, %p596_p11 }
  0x22   : > { %p599_p4 = pnand %p598_p3, %p592_p10 }
  0x24   : > { %602 = shalt.err (!%p599_p4)
}
  0x25   : > { %515 = dma.hbm_to_vmem [thread:$0]  (!%p740_p9), %s736_s30, 256, %s744_s5, %s149_s7  }
  0x26   : > { %p824_p1 = scmp.lt.s32.totalorder %s653_s17, 3  ;;  %p825_p5 = scmp.ge.s32.totalorder %s653_s17, 1 }
  0x28   : > { %p168_p13 = pnand %p825_p5, %p824_p1 }
  0x29   : > { %s173_s26 = sand.u32 (!%p168_p13), 1, %s637_s13  }
  0x2a   : > { %171 = sbr.rel (%p168_p13) target bundleno = 919 (0x397), region = 32  ;;  %s487_s27 = sshll.u32 (!%p168_p13), %s173_s26, 4 }
  0x2b   : > { %s174_s28 = scalar_lea.sflag (!%p168_p13), [#allocation5], %s173_s26  ;;  %s177_s29 = scalar_lea.vmem (!%p168_p13), [#allocation4], %s487_s27 }
  0x31   : > { %628 = dma.done.wait (%p723_p7), %s174_s28, 256  }
  0x32   : > { %630 = vsyncadd (%p723_p7), %s174_s28, 4294967040  ;;  %vm208_vm0 = vcmask 7168   ;;  %v656_v0 = vmov -inf   ;;  %v211_v1 = vld [vmem:[%s177_s29] sm:$0xff]  ;;  %v212_v2 = vld [vmem:[%s177_s29 + $0x8] sm:$0xff]  ;;  %v657_v5 = vmov 0.0  }
  0x33   : > { %210 = vst.msk [vmem:[#allocation3] sm:$0xff] %vm208_vm0, %v656_v0  ;;  %v217_v3 = vmax.f32 %v211_v1, %v212_v2  ;;  %v213_v4 = vadd.f32 %v212_v2, %v211_v1  ;;  %209 = vst.msk [vmem:[#allocation2] sm:$0xff] %vm208_vm0, %v657_v5  ;;  %500 = vmatprep.subr.mxu0 %v657_v5  ;;  %505 = vmatprep.subr.mxu1 %v657_v5  ;;  %vm658_vm1 = vmmov 0   ;;  %s659_s23 = smov 1   ;;  %v238_v16 = vld [vmem:[%s818_s1] sm:$0x3] }
  0x34   : > { %502 = vmatprep.mubr.msk.f32.mxu0 %vm658_vm1, %v657_v5  ;;  %507 = vmatprep.mubr.msk.f32.mxu1 %vm658_vm1, %v657_v5  ;;  %vm240_vm2 = vcmask 64512   ;;  %vm319_vm3 = vcmask 1041408   ;;  %v239_v21 = vld [vmem:[%s819_s2] sm:$0xff]  ;;  %vm315_vm4 = vcmask 15360   ;;  %p200_p7 = scmp.lt.s32.totalorder %s645_s15, 1 }
  0x35   : > { %218 = vmax.xlane.f32.xlu0 %v217_v3 }
  0x36   : > { %s834_s15 = smov (!%p200_p7, %s645_s15), 1 }
  0x37   : > { %s488_s7 = sshll.u32 %s834_s15, 3 }
  0x38   : > { %s203_s10 = scalar_lea.vmem %s820_s3, %s488_s7 }
  0x39   : > { %214 = vadd.xlane.f32.xlu0 %v213_v4 }
  0x3a   : > { %v224_v6 = vld [vmem:[#allocation3] sm:$0xff]  ;;  %v220_v9 = vld [vmem:[#allocation2] sm:$0xff] }
  0xc2   : > { %v219_v7 = vpop.xlane.xlu0 %218 }
  0xc3   : > { %v225_v8 = vmax.f32 %v224_v6, %v219_v7 }
  0xc5   : > { %226 = vst.msk [vmem:[#allocation3] sm:$0xff] %vm208_vm0, %v225_v8 }
  0xc6   : > { %v215_v10 = vpop.xlane.xlu0 %214 }
  0xc7   : > { %v221_v11 = vadd.f32 %v220_v9, %v215_v10 }
  0xc9   : > { %223 = vst.msk [vmem:[#allocation2] sm:$0xff] %vm208_vm0, %v221_v11 }
  0xcc   : > { %v232_v12 = vld [vmem:[#allocation3] sm:$0xff] }
  0xcd   : > { %234 = vrot.lane.b32.xlu1 %v232_v12, %s659_s23 }
  0xd0   : > { %v230_v13 = vld [vmem:[#allocation2] sm:$0xff] }
  0xd1   : > { %v231_v14 = vmul.f32 0.00390625, %v230_v13 }
 0x13f   : > { %v235_v15 = vpop.permute.xlu1 %234 }
 0x140   : > { %v237_v17 = vsel %vm208_vm0, %v231_v14, %v235_v15 }
 0x141   : > { %501 = vmatpush3.msra.mxu0 %v237_v17 }
 0x142   : > { %503 = vmatmul.mubr.msk.f32.vlgmr.msra.gmra.mrb[0].mxu0 %vm240_vm2, %v238_v16 }
 0x215   : > { %v310_v18 = vpop.f32.mrb[0].mxu0 }
 0x216   : > { %v314_v19 = vmax.f32 %v310_v18, 0.0  ;;  %v504_v20 = vpop.f32.mrb[1].mxu0 }
 0x218   : > { %506 = vmatpush3.msk.msra.mxu1 %vm319_vm3, %v314_v19 }
 0x219   : > { %508 = vmatmul.mubr.msk.f32.vlgmr.msra.gmra.mrb[0].mxu1 %vm315_vm4, %v239_v21 }
 0x2ec   : > { %v389_v22 = vpop.f32.mrb[0].mxu1 }
 0x2ed   : > { %v509_v23 = vpop.f32.mrb[1].mxu1  ;;  %v393_v24 = vsel %vm315_vm4, %v389_v22, 0.0 }
 0x2ee   : > { %394 = vadd.xlane.f32.xlu1 %v393_v24 }
 0x37b   : > { %v395_v25 = vpop.xlane.xlu1 %394 }
 0x37c   : > { %v492_v26 = vmul.f32 -1.442695, %v395_v25 }
 0x37e   : > { %569 = vpow2.f32 %v492_v26 }
 0x388   : > { %v570_v27 = vpop.eup %569 }
 0x389   : > { %v399_v28 = vadd.f32 1.0, %v570_v27 }
 0x38b   : > { %571 = vrcp.f32 %v399_v28 }
 0x395   : > { %v572_v29 = vpop.eup %571 }
 0x396   : > { %402 = vst.msk [vmem:[%s203_s10] sm:$0xff] %vm208_vm0, %v572_v29 }
 0x397 PF: > { %s16_s17 = sadd.s32 1, %s653_s17   ;;  %s826_s12 = smov %s637_s13 }
 0x398   : > { %p13_p9 = scmp.ge.s32.totalorder %s16_s17, 4   ;;  %s827_s13 = smov %s641_s14 }
 0x399   : > { %s828_s14 = smov %s729_s24  ;;  %s829_s15 = smov %s649_s16 }
 0x39a   : > { %s830_s16 = smov %s832_s19  ;;  %15 = sbr.rel (!%p13_p9) target bundleno = 4 (0x4), region = 80 }
 0x3a1   :  { %422 = vsyncpa [#allocation5], 1 }
 0x3a2   :  { %424 = vsyncpa [#allocation5 + $0x1], 1 }

</bundles_post_ra>
